<compile_context>
chip_gen: v5e
topology: v5e:2x2
jax: 0.10.0
libtpu: 0.0.40
codegen_flags: <defaults>
</compile_context>

<pallas_src>
import functools

import jax
import jax.numpy as jnp
from jax.experimental import pallas as pl
from jax.experimental.pallas import tpu as pltpu

KH = KW = 4
STRIDE = 2
PAD = 1
EPS = 1e-5
NEG_SLOPE = 0.01                      # nn.LeakyReLU() default

PASS1_TM_START = 2048                 # starting row tile for pass 1 (the VMEM budget loop shrinks it)
PASS2_BLOCK_BYTES = 4 << 20           # ~4 MiB f32 input block per pass-2 step (amortizes ~0.35us/step)


def _round_up(a, b):
    return (a + b - 1) // b * b


@functools.lru_cache(maxsize=None)
def _vmem_limit_bytes():
    """Generation-aware scoped-VMEM limit: ~3/4 of per-core VMEM, capped at 96 MiB (128 MiB parts)."""
    try:
        cap = int(pltpu.get_tpu_info().vmem_capacity_bytes)
    except Exception:
        cap = 64 * 1024 * 1024        # conservative (v7x-sized) fallback
    return min(cap * 3 // 4, 96 * 1024 * 1024)


# ----------------------- Pass 1: conv (grouped im2col matmul) + batch-stat accumulation ----------------
def conv_stats_kernel(p_ref, w_ref, conv_ref, sum_ref, sq_ref):
    """p_ref: (tm//g, g*K) bf16 grouped patches; w_ref: (g*K, g*Cout) bf16 (block-diagonal when g>1).
    conv_ref: (tm//g, g*Cout) f32 lane-dense conv tile.
    sum_ref/sq_ref: (8, g*Cout) f32 accumulators resident across the inner ("arbitrary") grid axis;
    one accumulator block per outer ("parallel" / megacore) grid index."""
    @pl.when(pl.program_id(1) == 0)
    def _init():
        sum_ref[...] = jnp.zeros_like(sum_ref)
        sq_ref[...] = jnp.zeros_like(sq_ref)

    # Conv2d as (grouped) im2col matmul: bf16 operands on the MXU, f32 accumulation.
    # NOTE: the Conv2d bias is intentionally omitted -- a per-channel constant added before
    # training-mode BatchNorm cancels exactly in the mean subtraction (not valid for running stats).
    conv = jnp.dot(p_ref[...], w_ref[...], preferred_element_type=jnp.float32)
    conv_ref[...] = conv

    # Per-(group-slot, channel) sum / sum-of-squares via MXU ones-matmuls (no XLU sublane reduction);
    # all 8 result rows are identical -- the wrapper reads row 0 and folds the g group slots.
    ones = jnp.ones((8, conv.shape[0]), jnp.float32)
    sum_ref[...] += jnp.dot(ones, conv, preferred_element_type=jnp.float32)
    sq_ref[...] += jnp.dot(ones, conv * conv, preferred_element_type=jnp.float32)


# ----------------------------- Pass 2: normalize (affine) + LeakyReLU ---------------------------------
def bn_act_kernel(y_ref, scale_ref, shift_ref, o_ref):
    y = y_ref[...] * scale_ref[...] + shift_ref[...]
    o_ref[...] = jnp.where(y >= 0, y, NEG_SLOPE * y).astype(o_ref.dtype)


def _im2col(x_nhwc):
    """4x4 / stride-2 / pad-1 patches, channels-last within each patch. Returns ((M, K), N, Ho, Wo)."""
    N, H, W, C = x_nhwc.shape
    xp = jnp.pad(x_nhwc, ((0, 0), (PAD, PAD), (PAD, PAD), (0, 0)))
    Ho = (H + 2 * PAD - KH) // STRIDE + 1
    Wo = (W + 2 * PAD - KW) // STRIDE + 1
    cols = []
    for i in range(KH):
        for j in range(KW):
            cols.append(xp[:, i:i + STRIDE * Ho:STRIDE, j:j + STRIDE * Wo:STRIDE, :])
    p = jnp.concatenate(cols, axis=-1)                    # (N, Ho, Wo, KH*KW*C)
    return p.reshape(N * Ho * Wo, KH * KW * C), N, Ho, Wo


def encoder_layer_forward(x_nhwc, params, is_last):
    w, b, gamma, beta = params
    del b  # Conv2d bias cancels exactly under training-mode BatchNorm (batch statistics).
    Cout = w.shape[0]

    # bf16 patches: halves im2col HBM traffic and feeds the bf16-native MXU.
    patches, N, Ho, Wo = _im2col(x_nhwc.astype(jnp.bfloat16))
    M, K = patches.shape
    # (Cout, Cin, KH, KW) -> (KH, KW, Cin, Cout) -> (K, Cout); matches the patch column order.
    w2d = jnp.transpose(w, (2, 3, 1, 0)).reshape(K, Cout).astype(jnp.bfloat16)

    # Lane-dense grouping: pack g = 128//Cout output rows into the 128-lane dim (block-diagonal weight)
    # so pass-1 stores (and the MXU N dimension) are full-width even for small channel counts.
    g = 128 // Cout if (Cout < 128 and 128 % Cout == 0) else 1
    Wc = g * Cout                                          # lane width of the conv intermediate
    Kg = g * K                                             # grouped patch width (== 1024 whenever g > 1)
    if g > 1:
        eye = jnp.eye(g, dtype=jnp.bfloat16)
        w_blk = (eye[:, None, :, None] * w2d[None, :, None, :]).reshape(Kg, Wc)
    else:
        w_blk = w2d

    limit = _vmem_limit_bytes()
    budget = limit * 3 // 4

    # ---- pass-1 tile sizing: largest tm (aligned so every block satisfies sublane/lane tiling) whose
    # double-buffered patch + conv tiles PLUS the double-buffered weight block fit the VMEM budget.
    align = max(128, 16 * g)                               # (tm//g) stays a multiple of 16 (bf16 tiles)
    bytes_per_row = 2 * K + 4 * Cout                       # bf16 patches + f32 conv per output row
    w_bytes = 2 * Kg * Wc * 2                              # weight block, double-buffered, bf16
    tm = PASS1_TM_START
    while tm > align and 2 * tm * bytes_per_row + w_bytes > budget:
        tm //= 2
    tm = max(align, min(tm, _round_up(M, align)))

    tiles_raw = pl.cdiv(M, tm)
    nouter = 2 if tiles_raw >= 2 else 1                    # v7x megacore: split the M loop across both TCs
    tiles = _round_up(tiles_raw, nouter)
    tiles_per = tiles // nouter
    m_pad = tiles * tm
    if m_pad != M:
        # Zero rows contribute exactly 0 to sum / sum-of-squares (no conv bias), so stats stay exact.
        patches = jnp.pad(patches, ((0, m_pad - M), (0, 0)))
    patches_g = patches.reshape(m_pad // g, Kg)            # contiguous row-major reshape (free)

    conv_g, csum, csq = pl.pallas_call(
        conv_stats_kernel,
        out_shape=(
            jax.ShapeDtypeStruct((m_pad // g, Wc), jnp.float32),
            jax.ShapeDtypeStruct((nouter * 8, Wc), jnp.float32),
            jax.ShapeDtypeStruct((nouter * 8, Wc), jnp.float32),
        ),
        grid=(nouter, tiles_per),
        in_specs=[
            pl.BlockSpec((tm // g, Kg), lambda o, i: (o * tiles_per + i, 0)),
            pl.BlockSpec((Kg, Wc), lambda o, i: (0, 0)),
        ],
        out_specs=(
            pl.BlockSpec((tm // g, Wc), lambda o, i: (o * tiles_per + i, 0)),
            pl.BlockSpec((8, Wc), lambda o, i: (o, 0)),    # per-core accumulator, resident across i
            pl.BlockSpec((8, Wc), lambda o, i: (o, 0)),
        ),
        compiler_params=pltpu.CompilerParams(
            dimension_semantics=("parallel", "arbitrary"),
            vmem_limit_bytes=limit),
    )(patches_g, w_blk)

    # ---- finalize batch statistics (tiny per-channel math) and fold gamma/beta into scale/shift.
    # NOTE: E[x^2] - mean^2 with f32 sums is cancellation-prone if |mean| >> std on raw inputs.
    s1 = csum.reshape(nouter, 8, Wc)[:, 0, :].sum(axis=0).reshape(g, Cout).sum(axis=0)
    s2 = csq.reshape(nouter, 8, Wc)[:, 0, :].sum(axis=0).reshape(g, Cout).sum(axis=0)
    mean = s1 / M
    var = jnp.maximum(s2 / M - mean * mean, 0.0)
    scale = gamma * jax.lax.rsqrt(var + EPS)
    shift = beta - mean * scale

    # ---- pass 2: lane-dense normalize + LeakyReLU on large blocks; bf16 output for interior layers.
    out_dtype = jnp.float32 if is_last else jnp.bfloat16
    scale_l = jnp.tile(scale, g).reshape(1, Wc)
    shift_l = jnp.tile(shift, g).reshape(1, Wc)

    R = m_pad // g                                         # multiple of 16 by construction
    rows = max(16, (PASS2_BLOCK_BYTES // (Wc * 4)) // 16 * 16)
    tm2 = min(rows, R)
    grid2 = (pl.cdiv(R, tm2),)

    out = pl.pallas_call(
        bn_act_kernel,
        out_shape=jax.ShapeDtypeStruct((R, Wc), out_dtype),
        grid=grid2,
        in_specs=[
            pl.BlockSpec((tm2, Wc), lambda i: (i, 0)),
            pl.BlockSpec((1, Wc), lambda i: (0, 0)),
            pl.BlockSpec((1, Wc), lambda i: (0, 0)),
        ],
        out_specs=pl.BlockSpec((tm2, Wc), lambda i: (i, 0)),
        compiler_params=pltpu.CompilerParams(
            dimension_semantics=("parallel",),             # shard across TensorCores on v7x megacore
            vmem_limit_bytes=limit),
    )(conv_g, scale_l, shift_l)

    return out.reshape(m_pad, Cout)[:M].reshape(N, Ho, Wo, Cout)


def encoder_block_forward(x_nchw, params):
    x = jnp.transpose(x_nchw, (0, 2, 3, 1))                # NCHW -> NHWC
    n = len(params)
    for idx, p in enumerate(params):
        x = encoder_layer_forward(x, p, is_last=(idx == n - 1))
    return jnp.transpose(x, (0, 3, 1, 2))                  # NHWC -> NCHW (final layer is f32)


def init_params(key, num_channel, num_layer):
    """Deterministic synthetic init matching the PyTorch module's parameter shapes."""
    params = []
    c = num_channel
    for _ in range(num_layer):
        key, k1, k2, k3, k4 = jax.random.split(key, 5)
        cout = 2 * c
        fan_in = c * KH * KW
        bound = 1.0 / (fan_in ** 0.5)
        w = jax.random.uniform(k1, (cout, c, KH, KW), jnp.float32, -bound, bound)
        b = jax.random.uniform(k2, (cout,), jnp.float32, -bound, bound)
        gamma = jax.random.uniform(k3, (cout,), jnp.float32, 0.5, 1.5)
        beta = jax.random.uniform(k4, (cout,), jnp.float32, -0.5, 0.5)
        params.append((w, b, gamma, beta))
        c = cout
    return params


def reference_forward(x_nchw, params, conv_dtype=jnp.float32):
    """Plain-JAX reference (lax.conv + training-mode BN + LeakyReLU).
    conv_dtype=bfloat16 mirrors the kernel's bf16 MXU operands (f32 accumulation) for a tight check."""
    x = x_nchw
    for (w, b, gamma, beta) in params:
        y = jax.lax.conv_general_dilated(
            x.astype(conv_dtype), w.astype(conv_dtype),
            window_strides=(STRIDE, STRIDE),
            padding=((PAD, PAD), (PAD, PAD)),
            dimension_numbers=("NCHW", "OIHW", "NCHW"),
            preferred_element_type=jnp.float32)
        y = y + b[None, :, None, None]                     # bias cancels under BN, kept for fidelity
        mean = jnp.mean(y, axis=(0, 2, 3), keepdims=True)
        var = jnp.mean((y - mean) ** 2, axis=(0, 2, 3), keepdims=True)
        y = (y - mean) * jax.lax.rsqrt(var + EPS)
        y = y * gamma[None, :, None, None] + beta[None, :, None, None]
        x = jnp.where(y >= 0, y, NEG_SLOPE * y)
    return x


if __name__ == "__main__":
    key = jax.random.PRNGKey(0)
    k_x, k_p = jax.random.split(key)

    num_channel, num_layer = 4, 2
    x = jax.random.normal(k_x, (2, num_channel, 16, 16), jnp.float32)   # NCHW
    params = init_params(k_p, num_channel, num_layer)

    fwd = jax.jit(encoder_block_forward)
    out = jax.block_until_ready(fwd(x, params))

    ref_bf16 = jax.block_until_ready(reference_forward(x, params, conv_dtype=jnp.bfloat16))
    ref_f32 = jax.block_until_ready(reference_forward(x, params, conv_dtype=jnp.float32))

    assert out.shape == ref_f32.shape == (2, num_channel * (2 ** num_layer), 4, 4)
    # Check vs a reference that also feeds bf16 operands to the conv (isolates kernel correctness;
    # slightly loosened from 5e-3 because interior-layer activations are now stored in bf16).
    assert jnp.allclose(out, ref_bf16, atol=1e-2, rtol=1e-2), float(jnp.max(jnp.abs(out - ref_bf16)))
    # Looser check vs exact f32 module semantics (bounds the intended bf16-matmul approximation).
    assert jnp.allclose(out, ref_f32, atol=1.5e-1, rtol=1.5e-1), float(jnp.max(jnp.abs(out - ref_f32)))

    print("KERNEL_OK")
</pallas_src>

<mosaic_0001>
module attributes {stable_mosaic.version = 11 : i64} {
  func.func @conv_stats_kernel(%arg0: i32, %arg1: i32, %arg2: memref<16x1024xbf16, #tpu.memory_space<vmem>>, %arg3: memref<1024x128xbf16, #tpu.memory_space<vmem>>, %arg4: memref<16x128xf32, #tpu.memory_space<vmem>>, %arg5: memref<8x128xf32, #tpu.memory_space<vmem>>, %arg6: memref<8x128xf32, #tpu.memory_space<vmem>>) attributes {dimension_semantics = [#tpu.dimension_semantics<parallel>, #tpu.dimension_semantics<arbitrary>], iteration_bounds = array<i64: 1, 1>, scalar_prefetch = 0 : i64, scratch_operands = 0 : i64, tpu.core_type = #tpu.core_type<tc>, window_params = [{transform_indices = @transform_0, window_bounds = array<i64: 16, 1024>}, {pipeline_mode = #tpu.pipeline_mode<synchronous>, transform_indices = @transform_1, window_bounds = array<i64: 1024, 128>}, {transform_indices = @transform_2, window_bounds = array<i64: 16, 128>}, {transform_indices = @transform_3, window_bounds = array<i64: 8, 128>}, {transform_indices = @transform_4, window_bounds = array<i64: 8, 128>}]} {
    %c0_i32 = arith.constant 0 : i32
    %0 = arith.cmpi eq, %arg1, %c0_i32 : i32
    %1 = arith.extui %0 : i1 to i32
    %c0_i32_0 = arith.constant 0 : i32
    %2 = arith.cmpi ne, %1, %c0_i32_0 : i32
    scf.if %2 {
      %cst_17 = arith.constant 0.000000e+00 : f32
      %17 = vector.broadcast %cst_17 : f32 to vector<8x128xf32>
      %c0_18 = arith.constant 0 : index
      %c0_19 = arith.constant 0 : index
      %18 = vector.load %arg5[%c0_18, %c0_19] : memref<8x128xf32, #tpu.memory_space<vmem>>, vector<8x128xf32>
      tpu.vector_store %arg5[%c0_18, %c0_19], %17 {strides = array<i32>} : memref<8x128xf32, #tpu.memory_space<vmem>>, vector<8x128xf32>,
      %cst_20 = arith.constant 0.000000e+00 : f32
      %19 = vector.broadcast %cst_20 : f32 to vector<8x128xf32>
      %c0_21 = arith.constant 0 : index
      %c0_22 = arith.constant 0 : index
      %20 = vector.load %arg6[%c0_21, %c0_22] : memref<8x128xf32, #tpu.memory_space<vmem>>, vector<8x128xf32>
      tpu.vector_store %arg6[%c0_21, %c0_22], %19 {strides = array<i32>} : memref<8x128xf32, #tpu.memory_space<vmem>>, vector<8x128xf32>,
    } else {
    }
    %c0 = arith.constant 0 : index
    %c0_1 = arith.constant 0 : index
    %3 = vector.load %arg2[%c0, %c0_1] : memref<16x1024xbf16, #tpu.memory_space<vmem>>, vector<16x1024xbf16>
    %c0_2 = arith.constant 0 : index
    %c0_3 = arith.constant 0 : index
    %4 = vector.load %arg3[%c0_2, %c0_3] : memref<1024x128xbf16, #tpu.memory_space<vmem>>, vector<1024x128xbf16>
    %cst = arith.constant dense<0.000000e+00> : vector<16x128xf32>
    %5 = tpu.matmul %3, %4, %cst {dimension_numbers = #tpu.dot_dimension_numbers<[1], [0], [0], [1], [0, 0, 1, 1], [], []>} : vector<16x1024xbf16>, vector<1024x128xbf16>, vector<16x128xf32> -> vector<16x128xf32>
    %c0_4 = arith.constant 0 : index
    %c0_5 = arith.constant 0 : index
    %6 = vector.load %arg4[%c0_4, %c0_5] : memref<16x128xf32, #tpu.memory_space<vmem>>, vector<16x128xf32>
    tpu.vector_store %arg4[%c0_4, %c0_5], %5 {strides = array<i32>} : memref<16x128xf32, #tpu.memory_space<vmem>>, vector<16x128xf32>,
    %cst_6 = arith.constant 1.000000e+00 : f32
    %7 = vector.broadcast %cst_6 : f32 to vector<8x16xf32>
    %c0_7 = arith.constant 0 : index
    %c0_8 = arith.constant 0 : index
    %8 = vector.load %arg5[%c0_7, %c0_8] : memref<8x128xf32, #tpu.memory_space<vmem>>, vector<8x128xf32>
    %cst_9 = arith.constant dense<0.000000e+00> : vector<8x128xf32>
    %9 = tpu.matmul %7, %5, %cst_9 {dimension_numbers = #tpu.dot_dimension_numbers<[1], [0], [0], [1], [0, 0, 1, 1], [], []>} : vector<8x16xf32>, vector<16x128xf32>, vector<8x128xf32> -> vector<8x128xf32>
    %10 = arith.addf %8, %9 : vector<8x128xf32>
    %c0_10 = arith.constant 0 : index
    %c0_11 = arith.constant 0 : index
    %11 = vector.load %arg5[%c0_10, %c0_11] : memref<8x128xf32, #tpu.memory_space<vmem>>, vector<8x128xf32>
    tpu.vector_store %arg5[%c0_10, %c0_11], %10 {strides = array<i32>} : memref<8x128xf32, #tpu.memory_space<vmem>>, vector<8x128xf32>,
    %c0_12 = arith.constant 0 : index
    %c0_13 = arith.constant 0 : index
    %12 = vector.load %arg6[%c0_12, %c0_13] : memref<8x128xf32, #tpu.memory_space<vmem>>, vector<8x128xf32>
    %13 = arith.mulf %5, %5 : vector<16x128xf32>
    %cst_14 = arith.constant dense<0.000000e+00> : vector<8x128xf32>
    %14 = tpu.matmul %7, %13, %cst_14 {dimension_numbers = #tpu.dot_dimension_numbers<[1], [0], [0], [1], [0, 0, 1, 1], [], []>} : vector<8x16xf32>, vector<16x128xf32>, vector<8x128xf32> -> vector<8x128xf32>
    %15 = arith.addf %12, %14 : vector<8x128xf32>
    %c0_15 = arith.constant 0 : index
    %c0_16 = arith.constant 0 : index
    %16 = vector.load %arg6[%c0_15, %c0_16] : memref<8x128xf32, #tpu.memory_space<vmem>>, vector<8x128xf32>
    tpu.vector_store %arg6[%c0_15, %c0_16], %15 {strides = array<i32>} : memref<8x128xf32, #tpu.memory_space<vmem>>, vector<8x128xf32>,
    return
  }
  func.func @transform_0(%arg0: i32, %arg1: i32) -> (i32, i32) {
    %c1_i32 = arith.constant 1 : i32
    %0 = arith.muli %arg0, %c1_i32 : i32
    %1 = arith.addi %0, %arg1 : i32
    %c0_i32 = arith.constant 0 : i32
    %c0_i32_0 = arith.constant 0 : i32
    return %1, %c0_i32 : i32, i32
  }
  func.func @transform_1(%arg0: i32, %arg1: i32) -> (i32, i32) {
    %c0_i32 = arith.constant 0 : i32
    %c0_i32_0 = arith.constant 0 : i32
    %c0_i32_1 = arith.constant 0 : i32
    return %c0_i32, %c0_i32_0 : i32, i32
  }
  func.func @transform_2(%arg0: i32, %arg1: i32) -> (i32, i32) {
    %c1_i32 = arith.constant 1 : i32
    %0 = arith.muli %arg0, %c1_i32 : i32
    %1 = arith.addi %0, %arg1 : i32
    %c0_i32 = arith.constant 0 : i32
    %c0_i32_0 = arith.constant 0 : i32
    return %1, %c0_i32 : i32, i32
  }
  func.func @transform_3(%arg0: i32, %arg1: i32) -> (i32, i32) {
    %c0_i32 = arith.constant 0 : i32
    %c0_i32_0 = arith.constant 0 : i32
    return %arg0, %c0_i32 : i32, i32
  }
  func.func @transform_4(%arg0: i32, %arg1: i32) -> (i32, i32) {
    %c0_i32 = arith.constant 0 : i32
    %c0_i32_0 = arith.constant 0 : i32
    return %arg0, %c0_i32 : i32, i32
  }
}

module attributes {stable_mosaic.version = 11 : i64} {
  func.func @bn_act_kernel(%arg0: i32, %arg1: memref<16x128xf32, #tpu.memory_space<vmem>>, %arg2: memref<1x128xf32, #tpu.memory_space<vmem>>, %arg3: memref<1x128xf32, #tpu.memory_space<vmem>>, %arg4: memref<16x128xbf16, #tpu.memory_space<vmem>>) attributes {dimension_semantics = [#tpu.dimension_semantics<parallel>], iteration_bounds = array<i64: 1>, scalar_prefetch = 0 : i64, scratch_operands = 0 : i64, tpu.core_type = #tpu.core_type<tc>, window_params = [{transform_indices = @transform_0, window_bounds = array<i64: 16, 128>}, {pipeline_mode = #tpu.pipeline_mode<synchronous>, transform_indices = @transform_1, window_bounds = array<i64: 1, 128>}, {pipeline_mode = #tpu.pipeline_mode<synchronous>, transform_indices = @transform_2, window_bounds = array<i64: 1, 128>}, {transform_indices = @transform_3, window_bounds = array<i64: 16, 128>}]} {
    %c0 = arith.constant 0 : index
    %c0_0 = arith.constant 0 : index
    %0 = vector.load %arg1[%c0, %c0_0] : memref<16x128xf32, #tpu.memory_space<vmem>>, vector<16x128xf32>
    %c0_1 = arith.constant 0 : index
    %c0_2 = arith.constant 0 : index
    %1 = vector.load %arg2[%c0_1, %c0_2] : memref<1x128xf32, #tpu.memory_space<vmem>>, vector<1x128xf32>
    %2 = vector.broadcast %1 : vector<1x128xf32> to vector<16x128xf32>
    %3 = arith.mulf %0, %2 : vector<16x128xf32>
    %c0_3 = arith.constant 0 : index
    %c0_4 = arith.constant 0 : index
    %4 = vector.load %arg3[%c0_3, %c0_4] : memref<1x128xf32, #tpu.memory_space<vmem>>, vector<1x128xf32>
    %5 = vector.broadcast %4 : vector<1x128xf32> to vector<16x128xf32>
    %6 = arith.addf %3, %5 : vector<16x128xf32>
    %cst = arith.constant 0.000000e+00 : f32
    %7 = vector.broadcast %cst : f32 to vector<16x128xf32>
    %8 = arith.cmpf oge, %6, %7 : vector<16x128xf32>
    %cst_5 = arith.constant 0.00999999977 : f32
    %9 = vector.broadcast %cst_5 : f32 to vector<16x128xf32>
    %10 = arith.mulf %9, %6 : vector<16x128xf32>
    %11 = arith.select %8, %6, %10 : vector<16x128xi1>, vector<16x128xf32>
    %12 = arith.truncf %11 : vector<16x128xf32> to vector<16x128xbf16>
    %c0_6 = arith.constant 0 : index
    %c0_7 = arith.constant 0 : index
    %13 = vector.load %arg4[%c0_6, %c0_7] : memref<16x128xbf16, #tpu.memory_space<vmem>>, vector<16x128xbf16>
    tpu.vector_store %arg4[%c0_6, %c0_7], %12 {strides = array<i32>} : memref<16x128xbf16, #tpu.memory_space<vmem>>, vector<16x128xbf16>,
    return
  }
  func.func @transform_0(%arg0: i32) -> (i32, i32) {
    %c0_i32 = arith.constant 0 : i32
    %c0_i32_0 = arith.constant 0 : i32
    return %arg0, %c0_i32 : i32, i32
  }
  func.func @transform_1(%arg0: i32) -> (i32, i32) {
    %c0_i32 = arith.constant 0 : i32
    %c0_i32_0 = arith.constant 0 : i32
    %c0_i32_1 = arith.constant 0 : i32
    return %c0_i32, %c0_i32_0 : i32, i32
  }
  func.func @transform_2(%arg0: i32) -> (i32, i32) {
    %c0_i32 = arith.constant 0 : i32
    %c0_i32_0 = arith.constant 0 : i32
    %c0_i32_1 = arith.constant 0 : i32
    return %c0_i32, %c0_i32_0 : i32, i32
  }
  func.func @transform_3(%arg0: i32) -> (i32, i32) {
    %c0_i32 = arith.constant 0 : i32
    %c0_i32_0 = arith.constant 0 : i32
    return %arg0, %c0_i32 : i32, i32
  }
}

module attributes {stable_mosaic.version = 11 : i64} {
  func.func @bn_act_kernel(%arg0: i32, %arg1: memref<16x128xf32, #tpu.memory_space<vmem>>, %arg2: memref<1x128xf32, #tpu.memory_space<vmem>>, %arg3: memref<1x128xf32, #tpu.memory_space<vmem>>, %arg4: memref<16x128xf32, #tpu.memory_space<vmem>>) attributes {dimension_semantics = [#tpu.dimension_semantics<parallel>], iteration_bounds = array<i64: 1>, scalar_prefetch = 0 : i64, scratch_operands = 0 : i64, tpu.core_type = #tpu.core_type<tc>, window_params = [{transform_indices = @transform_0, window_bounds = array<i64: 16, 128>}, {pipeline_mode = #tpu.pipeline_mode<synchronous>, transform_indices = @transform_1, window_bounds = array<i64: 1, 128>}, {pipeline_mode = #tpu.pipeline_mode<synchronous>, transform_indices = @transform_2, window_bounds = array<i64: 1, 128>}, {transform_indices = @transform_3, window_bounds = array<i64: 16, 128>}]} {
    %c0 = arith.constant 0 : index
    %c0_0 = arith.constant 0 : index
    %0 = vector.load %arg1[%c0, %c0_0] : memref<16x128xf32, #tpu.memory_space<vmem>>, vector<16x128xf32>
    %c0_1 = arith.constant 0 : index
    %c0_2 = arith.constant 0 : index
    %1 = vector.load %arg2[%c0_1, %c0_2] : memref<1x128xf32, #tpu.memory_space<vmem>>, vector<1x128xf32>
    %2 = vector.broadcast %1 : vector<1x128xf32> to vector<16x128xf32>
    %3 = arith.mulf %0, %2 : vector<16x128xf32>
    %c0_3 = arith.constant 0 : index
    %c0_4 = arith.constant 0 : index
    %4 = vector.load %arg3[%c0_3, %c0_4] : memref<1x128xf32, #tpu.memory_space<vmem>>, vector<1x128xf32>
    %5 = vector.broadcast %4 : vector<1x128xf32> to vector<16x128xf32>
    %6 = arith.addf %3, %5 : vector<16x128xf32>
    %cst = arith.constant 0.000000e+00 : f32
    %7 = vector.broadcast %cst : f32 to vector<16x128xf32>
    %8 = arith.cmpf oge, %6, %7 : vector<16x128xf32>
    %cst_5 = arith.constant 0.00999999977 : f32
    %9 = vector.broadcast %cst_5 : f32 to vector<16x128xf32>
    %10 = arith.mulf %9, %6 : vector<16x128xf32>
    %11 = arith.select %8, %6, %10 : vector<16x128xi1>, vector<16x128xf32>
    %c0_6 = arith.constant 0 : index
    %c0_7 = arith.constant 0 : index
    %12 = vector.load %arg4[%c0_6, %c0_7] : memref<16x128xf32, #tpu.memory_space<vmem>>, vector<16x128xf32>
    tpu.vector_store %arg4[%c0_6, %c0_7], %11 {strides = array<i32>} : memref<16x128xf32, #tpu.memory_space<vmem>>, vector<16x128xf32>,
    return
  }
  func.func @transform_0(%arg0: i32) -> (i32, i32) {
    %c0_i32 = arith.constant 0 : i32
    %c0_i32_0 = arith.constant 0 : i32
    return %arg0, %c0_i32 : i32, i32
  }
  func.func @transform_1(%arg0: i32) -> (i32, i32) {
    %c0_i32 = arith.constant 0 : i32
    %c0_i32_0 = arith.constant 0 : i32
    %c0_i32_1 = arith.constant 0 : i32
    return %c0_i32, %c0_i32_0 : i32, i32
  }
  func.func @transform_2(%arg0: i32) -> (i32, i32) {
    %c0_i32 = arith.constant 0 : i32
    %c0_i32_0 = arith.constant 0 : i32
    %c0_i32_1 = arith.constant 0 : i32
    return %c0_i32, %c0_i32_0 : i32, i32
  }
  func.func @transform_3(%arg0: i32) -> (i32, i32) {
    %c0_i32 = arith.constant 0 : i32
    %c0_i32_0 = arith.constant 0 : i32
    return %arg0, %c0_i32 : i32, i32
  }
}

</mosaic_0001>

<bundles_post_ra>
// kernel: tile.23
= control target key start
LH: loop header
LB: loop body
LE: loop exit
PB: predicated region body
PF: predicated region fallthrough
CT: control target
= control target key end

     0   :  { %s28_s0 = inlined_call_operand.vmem [shape: f32[8], index: 0, kind: input, shape index: {}]   ;;  %s29_s1 = inlined_call_operand.vmem [shape: f32[16,8], index: 1, kind: output, shape index: {}]  }
   0x1   :  { %v4_v0 = vld [vmem:[%s28_s0] ss:$0 sm:$0xff] }
   0x2   :  { %5 = vst [vmem:[%s29_s1] sm:$0xff] %v4_v0 }
   0x3   :  { %8 = vst [vmem:[%s29_s1 + $0x8] sm:$0xff] %v4_v0 }

// kernel: tile.24
= control target key start
LH: loop header
LB: loop body
LE: loop exit
PB: predicated region body
PF: predicated region fallthrough
CT: control target
= control target key end

     0   :  { %s131_s10 = smov 120   ;;  %s132_s11 = smov 104   ;;  %vm3_vm0 = vcmask 64512   ;;  %vm9_vm1 = vcmask 1048512   ;;  %vm15_vm2 = vcmask 982912   ;;  %vm21_vm3 = vcmask 917312   ;;  %s207_s0 = inlined_call_operand.vmem [shape: f32[16,8], index: 0, kind: input, shape index: {}]   ;;  %s208_s1 = inlined_call_operand.vmem [shape: f32[1,128], index: 1, kind: output, shape index: {}]  }
   0x1   :  { %v101_v0 = vld [vmem:[%s207_s0 + $0xf] sm:$0x1]   ;;  %v103_v1 = vld [vmem:[%s207_s0 + $0xd] sm:$0x1]   ;;  %v105_v2 = vld [vmem:[%s207_s0 + $0xb] sm:$0x1]  }
   0x2   :  { %7 = vrot.lane.b32.xlu0 %v101_v0, %s131_s10  ;;  %19 = vrot.lane.b32.xlu1 %v103_v1, %s132_s11  ;;  %s133_s14 = smov 88   ;;  %v102_v3 = vld [vmem:[%s207_s0 + $0xe] sm:$0x1]   ;;  %v104_v4 = vld [vmem:[%s207_s0 + $0xc] sm:$0x1]   ;;  %s134_s19 = smov 112  }
   0x3   :  { %31 = vrot.lane.b32.xlu2 %v105_v2, %s133_s14  ;;  %s135_s20 = smov 96   ;;  %v106_v5 = vld [vmem:[%s207_s0 + $0xa] sm:$0x1]   ;;  %s136_s23 = smov 80   ;;  %v107_v6 = vld [vmem:[%s207_s0 + $0x9] sm:$0x1]  }
   0x4   :  { %v108_v7 = vld [vmem:[%s207_s0 + $0x8] sm:$0x1]   ;;  %s137_s28 = smov 72   ;;  %s138_s29 = smov 64   ;;  %v109_v8 = vld [vmem:[%s207_s0 + $0x7] sm:$0x1]  }
   0x5   :  { %s139_s3 = smov 56   ;;  %v110_v9 = vld [vmem:[%s207_s0 + $0x6] sm:$0x1]   ;;  %v111_v10 = vld [vmem:[%s207_s0 + $0x5] sm:$0x1]   ;;  %s140_s8 = smov 48  }
   0x6   :  { %s141_s9 = smov 40   ;;  %v112_v11 = vld [vmem:[%s207_s0 + $0x4] sm:$0x1]   ;;  %s142_s12 = smov 32   ;;  %v113_v12 = vld [vmem:[%s207_s0 + $0x3] sm:$0x1]  }
   0x7   :  { %v114_v13 = vld [vmem:[%s207_s0 + $0x2] sm:$0x1]   ;;  %s143_s17 = smov 24   ;;  %s144_s18 = smov 16   ;;  %v115_v14 = vld [vmem:[%s207_s0 + $0x1] sm:$0x1]  }
   0x8   :  { %s145_s21 = smov 8   ;;  %v2_v15 = vld [vmem:[%s207_s0] sm:$0x1]   ;;  %vm27_vm4 = vcmask 851712   ;;  %vm33_vm5 = vcmask 786112   ;;  %vm39_vm6 = vcmask 720512  }
   0x9   :  { %4 = vst.msk [vmem:[#allocation0] sm:$0x1] %vm3_vm0, %v2_v15   ;;  %vm45_vm7 = vcmask 654912   ;;  %vm51_vm8 = vcmask 589312   ;;  %vm57_vm9 = vcmask 523712   ;;  %vm63_vm10 = vcmask 458112  }
   0xa   :  { %13 = vrot.lane.b32.xlu0 %v102_v3, %s134_s19  ;;  %25 = vrot.lane.b32.xlu1 %v104_v4, %s135_s20  ;;  %vm69_vm11 = vcmask 392512   ;;  %vm75_vm12 = vcmask 326912   ;;  %vm81_vm13 = vcmask 261312   ;;  %vm87_vm14 = vcmask 195712  }
   0xb   :  { %37 = vrot.lane.b32.xlu2 %v106_v5, %s136_s23  ;;  %vm93_vm15 = vcmask 130112  }
  0x12   :  { %43 = vrot.lane.b32.xlu0 %v107_v6, %s137_s28  ;;  %49 = vrot.lane.b32.xlu1 %v108_v7, %s138_s29 }
  0x13   :  { %55 = vrot.lane.b32.xlu2 %v109_v8, %s139_s3 }
  0x1a   :  { %61 = vrot.lane.b32.xlu0 %v110_v9, %s140_s8  ;;  %67 = vrot.lane.b32.xlu1 %v111_v10, %s141_s9 }
  0x1b   :  { %73 = vrot.lane.b32.xlu2 %v112_v11, %s142_s12 }
  0x22   :  { %79 = vrot.lane.b32.xlu0 %v113_v12, %s143_s17  ;;  %85 = vrot.lane.b32.xlu1 %v114_v13, %s144_s18 }
  0x23   :  { %91 = vrot.lane.b32.xlu2 %v115_v14, %s145_s21 }
  0x5d   :  { %v32_v16 = vpop.permute.xlu2 %31  }
  0x65   :  { %v38_v17 = vpop.permute.xlu2 %37  }
  0x6d   :  { %v56_v18 = vpop.permute.xlu2 %55  }
  0x74   :  { %v8_v19 = vpop.permute.xlu0 %7   ;;  %v20_v20 = vpop.permute.xlu1 %19  }
  0x75   :  { %10 = vst.msk [vmem:[#allocation0] sm:$0x1] %vm9_vm1, %v8_v19   ;;  %v74_v21 = vpop.permute.xlu2 %73  }
  0x7c   :  { %v14_v22 = vpop.permute.xlu0 %13   ;;  %v26_v23 = vpop.permute.xlu1 %25  }
  0x7d   :  { %16 = vst.msk [vmem:[#allocation0] sm:$0x1] %vm15_vm2, %v14_v22   ;;  %v92_v24 = vpop.permute.xlu2 %91  }
  0x7e   :  { %22 = vst.msk [vmem:[#allocation0] sm:$0x1] %vm21_vm3, %v20_v20  }
  0x7f   :  { %28 = vst.msk [vmem:[#allocation0] sm:$0x1] %vm27_vm4, %v26_v23  }
  0x80   :  { %34 = vst.msk [vmem:[#allocation0] sm:$0x1] %vm33_vm5, %v32_v16  }
  0x81   :  { %40 = vst.msk [vmem:[#allocation0] sm:$0x1] %vm39_vm6, %v38_v17  }
  0x84   :  { %v44_v25 = vpop.permute.xlu0 %43   ;;  %v50_v26 = vpop.permute.xlu1 %49  }
  0x85   :  { %46 = vst.msk [vmem:[#allocation0] sm:$0x1] %vm45_vm7, %v44_v25  }
  0x86   :  { %52 = vst.msk [vmem:[#allocation0] sm:$0x1] %vm51_vm8, %v50_v26  }
  0x87   :  { %58 = vst.msk [vmem:[#allocation0] sm:$0x1] %vm57_vm9, %v56_v18  }
  0x8c   :  { %v62_v27 = vpop.permute.xlu0 %61   ;;  %v68_v28 = vpop.permute.xlu1 %67  }
  0x8d   :  { %64 = vst.msk [vmem:[#allocation0] sm:$0x1] %vm63_vm10, %v62_v27  }
  0x8e   :  { %70 = vst.msk [vmem:[#allocation0] sm:$0x1] %vm69_vm11, %v68_v28  }
  0x8f   :  { %76 = vst.msk [vmem:[#allocation0] sm:$0x1] %vm75_vm12, %v74_v21  }
  0x94   :  { %v80_v29 = vpop.permute.xlu0 %79   ;;  %v86_v30 = vpop.permute.xlu1 %85  }
  0x95   :  { %82 = vst.msk [vmem:[#allocation0] sm:$0x1] %vm81_vm13, %v80_v29  }
  0x96   :  { %88 = vst.msk [vmem:[#allocation0] sm:$0x1] %vm87_vm14, %v86_v30  }
  0x97   :  { %94 = vst.msk [vmem:[#allocation0] sm:$0x1] %vm93_vm15, %v92_v24  }
  0x9e   :  { %v97_v31 = vld [vmem:[#allocation0] sm:$0x1] }
  0x9f   :  { %100 = vst [vmem:[%s208_s1] sm:$0x1] %v97_v31 }

// kernel: encoder_block_forward.4
= control target key start
LH: loop header
LB: loop body
LE: loop exit
PB: predicated region body
PF: predicated region fallthrough
CT: control target
= control target key end

     0   :  { %vm734_vm0 = vcmask 130048   ;;  %s1467_s1 = inlined_call_operand.vmem [shape: bf16[1024,128], index: 1, kind: input, shape index: {}]   ;;  %s1468_s0 = inlined_call_operand.vmem [shape: bf16[16,1024], index: 0, kind: input, shape index: {}]   ;;  %s1469_s2 = inlined_call_operand.vmem [shape: f32[16,128], index: 2, kind: output, shape index: {0}]   ;;  %s1470_s3 = inlined_call_operand.vmem [shape: f32[8,128], index: 3, kind: output, shape index: {1}]   ;;  %s1471_s4 = inlined_call_operand.vmem [shape: f32[8,128], index: 4, kind: output, shape index: {2}]  }
   0x1   :  { %v1130_v0 = vld [vmem:[%s1467_s1 + $0x38] sm:$0xff]  ;;  %v1129_v4 = vld [vmem:[%s1467_s1 + $0x30] sm:$0xff]  ;;  %v1128_v8 = vld [vmem:[%s1467_s1 + $0x28] sm:$0xff] }
   0x2   :  { %v1138_v1 = vld [vmem:[%s1467_s1 + $0x78] sm:$0xff]  ;;  %619 = vmatpush.bf16.msra.mxu0 %v1130_v0  ;;  %v1137_v5 = vld [vmem:[%s1467_s1 + $0x70] sm:$0xff]  ;;  %v1136_v9 = vld [vmem:[%s1467_s1 + $0x68] sm:$0xff] }
   0x3   :  { %v1146_v2 = vld [vmem:[%s1467_s1 + $0xb8] sm:$0xff]  ;;  %633 = vmatpush.bf16.msra.mxu1 %v1138_v1  ;;  %v1145_v6 = vld [vmem:[%s1467_s1 + $0xb0] sm:$0xff]  ;;  %v1144_v10 = vld [vmem:[%s1467_s1 + $0xa8] sm:$0xff] }
   0x4   :  { %v1154_v3 = vld [vmem:[%s1467_s1 + $0xf8] sm:$0xff]  ;;  %647 = vmatpush.bf16.msra.mxu2 %v1146_v2  ;;  %v1153_v7 = vld [vmem:[%s1467_s1 + $0xf0] sm:$0xff]  ;;  %v1152_v11 = vld [vmem:[%s1467_s1 + $0xe8] sm:$0xff] }
   0x5   :  { %661 = vmatpush.bf16.msra.mxu3 %v1154_v3  ;;  %v1127_v12 = vld [vmem:[%s1467_s1 + $0x20] sm:$0xff]  ;;  %v1126_v16 = vld [vmem:[%s1467_s1 + $0x18] sm:$0xff]  ;;  %v1125_v20 = vld [vmem:[%s1467_s1 + $0x10] sm:$0xff] }
   0x6   :  { %620 = vmatpush.bf16.msra.mxu0 %v1129_v4  ;;  %v1135_v13 = vld [vmem:[%s1467_s1 + $0x60] sm:$0xff]  ;;  %v1134_v17 = vld [vmem:[%s1467_s1 + $0x58] sm:$0xff]  ;;  %v1133_v21 = vld [vmem:[%s1467_s1 + $0x50] sm:$0xff] }
   0x7   :  { %634 = vmatpush.bf16.msra.mxu1 %v1137_v5  ;;  %v1143_v14 = vld [vmem:[%s1467_s1 + $0xa0] sm:$0xff]  ;;  %v1142_v18 = vld [vmem:[%s1467_s1 + $0x98] sm:$0xff]  ;;  %v1141_v22 = vld [vmem:[%s1467_s1 + $0x90] sm:$0xff] }
   0x8   :  { %648 = vmatpush.bf16.msra.mxu2 %v1145_v6  ;;  %v1151_v15 = vld [vmem:[%s1467_s1 + $0xe0] sm:$0xff]  ;;  %v1150_v19 = vld [vmem:[%s1467_s1 + $0xd8] sm:$0xff]  ;;  %v1149_v23 = vld [vmem:[%s1467_s1 + $0xd0] sm:$0xff] }
   0x9   :  { %662 = vmatpush.bf16.msra.mxu3 %v1153_v7  ;;  %v1124_v24 = vld [vmem:[%s1467_s1 + $0x8] sm:$0xff]  ;;  %v1123_v28 = vld [vmem:[%s1467_s1] sm:$0xff]  ;;  %v1162_v32 = vld [vmem:[%s1467_s1 + $0x138] sm:$0xff] }
   0xa   :  { %621 = vmatpush.bf16.msra.mxu0 %v1128_v8  ;;  %v1132_v25 = vld [vmem:[%s1467_s1 + $0x48] sm:$0xff]  ;;  %v1131_v29 = vld [vmem:[%s1467_s1 + $0x40] sm:$0xff]  ;;  %v1170_v33 = vld [vmem:[%s1467_s1 + $0x178] sm:$0xff] }
   0xb   :  { %635 = vmatpush.bf16.msra.mxu1 %v1136_v9  ;;  %v1140_v26 = vld [vmem:[%s1467_s1 + $0x88] sm:$0xff]  ;;  %v1139_v30 = vld [vmem:[%s1467_s1 + $0x80] sm:$0xff]  ;;  %v1178_v42 = vld [vmem:[%s1467_s1 + $0x1b8] sm:$0xff] }
   0xc   :  { %649 = vmatpush.bf16.msra.mxu2 %v1144_v10  ;;  %v1148_v27 = vld [vmem:[%s1467_s1 + $0xc8] sm:$0xff]  ;;  %v1147_v31 = vld [vmem:[%s1467_s1 + $0xc0] sm:$0xff]  ;;  %v1186_v43 = vld [vmem:[%s1467_s1 + $0x1f8] sm:$0xff] }
   0xd   :  { %663 = vmatpush.bf16.msra.mxu3 %v1152_v11  ;;  %v835_v34 = vld [vmem:[%s1468_s0 + $0x8] sm:$0xf]  ;;  %v1116_v36 = vld [vmem:[%s1468_s0 + $0xc] sm:$0xf]  ;;  %v827_v38 = vld [vmem:[%s1468_s0] sm:$0xf] }
   0xe   :  { %622 = vmatpush.bf16.msra.mxu0 %v1127_v12  ;;  %v1120_v35 = vld [vmem:[%s1468_s0 + $0x24] sm:$0xf0]  ;;  %v837_v37 = vld [vmem:[%s1468_s0 + $0x28] sm:$0xf0]  ;;  %v1119_v39 = vld [vmem:[%s1468_s0 + $0x1c] sm:$0xf0] }
   0xf   :  { %636 = vmatpush.bf16.msra.mxu1 %v1135_v13  ;;  %v1115_v40 = vld [vmem:[%s1468_s0 + $0x4] sm:$0xf]  ;;  %v836_v44 = vor.u32 %v1120_v35, %v835_v34  ;;  %v840_v45 = vor.u32 %v1116_v36, %v837_v37  ;;  %v828_v46 = vor.u32 %v1119_v39, %v827_v38  ;;  %v1161_v48 = vld [vmem:[%s1467_s1 + $0x130] sm:$0xff]  ;;  %v1160_v52 = vld [vmem:[%s1467_s1 + $0x128] sm:$0xff] }
  0x10   :  { %650 = vmatpush.bf16.msra.mxu2 %v1143_v14  ;;  %v829_v41 = vld [vmem:[%s1468_s0 + $0x20] sm:$0xf0]  ;;  %v1169_v49 = vld [vmem:[%s1467_s1 + $0x170] sm:$0xff]  ;;  %v1168_v53 = vld [vmem:[%s1467_s1 + $0x168] sm:$0xff] }
  0x11   :  { %664 = vmatpush.bf16.msra.mxu3 %v1151_v15  ;;  %v832_v47 = vor.u32 %v1115_v40, %v829_v41  ;;  %v1177_v50 = vld [vmem:[%s1467_s1 + $0x1b0] sm:$0xff]  ;;  %v1176_v54 = vld [vmem:[%s1467_s1 + $0x1a8] sm:$0xff]  ;;  %v1159_v56 = vld [vmem:[%s1467_s1 + $0x120] sm:$0xff] }
  0x12   :  { %623 = vmatpush.bf16.msra.mxu0 %v1126_v16  ;;  %v1185_v51 = vld [vmem:[%s1467_s1 + $0x1f0] sm:$0xff]  ;;  %v1184_v55 = vld [vmem:[%s1467_s1 + $0x1e8] sm:$0xff]  ;;  %v1167_v57 = vld [vmem:[%s1467_s1 + $0x160] sm:$0xff] }
  0x13   :  { %637 = vmatpush.bf16.msra.mxu1 %v1134_v17  ;;  %v1175_v58 = vld [vmem:[%s1467_s1 + $0x1a0] sm:$0xff]  ;;  %v1158_v60 = vld [vmem:[%s1467_s1 + $0x118] sm:$0xff]  ;;  %v1157_v0 = vld [vmem:[%s1467_s1 + $0x110] sm:$0xff] }
  0x14   :  { %651 = vmatpush.bf16.msra.mxu2 %v1142_v18  ;;  %v1183_v59 = vld [vmem:[%s1467_s1 + $0x1e0] sm:$0xff]  ;;  %v1166_v61 = vld [vmem:[%s1467_s1 + $0x158] sm:$0xff]  ;;  %v1165_v1 = vld [vmem:[%s1467_s1 + $0x150] sm:$0xff] }
  0x15   :  { %665 = vmatpush.bf16.msra.mxu3 %v1150_v19  ;;  %v1174_v62 = vld [vmem:[%s1467_s1 + $0x198] sm:$0xff]  ;;  %v1173_v2 = vld [vmem:[%s1467_s1 + $0x190] sm:$0xff]  ;;  %v1156_v4 = vld [vmem:[%s1467_s1 + $0x108] sm:$0xff] }
  0x16   :  { %624 = vmatpush.bf16.msra.mxu0 %v1125_v20  ;;  %v1182_v63 = vld [vmem:[%s1467_s1 + $0x1d8] sm:$0xff]  ;;  %v1181_v3 = vld [vmem:[%s1467_s1 + $0x1d0] sm:$0xff]  ;;  %v1164_v5 = vld [vmem:[%s1467_s1 + $0x148] sm:$0xff] }
  0x17   :  { %638 = vmatpush.bf16.msra.mxu1 %v1133_v21  ;;  %v1172_v6 = vld [vmem:[%s1467_s1 + $0x188] sm:$0xff]  ;;  %v1155_v8 = vld [vmem:[%s1467_s1 + $0x100] sm:$0xff]  ;;  %v843_v12 = vld [vmem:[%s1468_s0 + $0x10] sm:$0xf] }
  0x18   :  { %652 = vmatpush.bf16.msra.mxu2 %v1141_v22  ;;  %v1180_v7 = vld [vmem:[%s1467_s1 + $0x1c8] sm:$0xff]  ;;  %v1163_v9 = vld [vmem:[%s1467_s1 + $0x140] sm:$0xff]  ;;  %v1121_v13 = vld [vmem:[%s1468_s0 + $0x2c] sm:$0xf0] }
  0x19   :  { %666 = vmatpush.bf16.msra.mxu3 %v1149_v23  ;;  %v1171_v10 = vld [vmem:[%s1467_s1 + $0x180] sm:$0xff]  ;;  %v1117_v14 = vld [vmem:[%s1468_s0 + $0x14] sm:$0xf]  ;;  %v851_v16 = vld [vmem:[%s1468_s0 + $0x18] sm:$0xf]  ;;  %v844_v20 = vor.u32 %v1121_v13, %v843_v12 }
  0x1a   :  { %625 = vmatpush.bf16.msra.mxu0 %v1124_v24  ;;  %v1179_v11 = vld [vmem:[%s1467_s1 + $0x1c0] sm:$0xff]  ;;  %v845_v15 = vld [vmem:[%s1468_s0 + $0x30] sm:$0xf0]  ;;  %v1122_v17 = vld [vmem:[%s1468_s0 + $0x34] sm:$0xf0] }
  0x1b   :  { %639 = vmatpush.bf16.msra.mxu1 %v1132_v25  ;;  %v1118_v18 = vld [vmem:[%s1468_s0 + $0x1c] sm:$0xf]  ;;  %v848_v21 = vor.u32 %v1117_v14, %v845_v15  ;;  %v852_v22 = vor.u32 %v1122_v17, %v851_v16 }
  0x1c   :  { %653 = vmatpush.bf16.msra.mxu2 %v1140_v26  ;;  %v853_v19 = vld [vmem:[%s1468_s0 + $0x38] sm:$0xf0] }
  0x1d   :  { %667 = vmatpush.bf16.msra.mxu3 %v1148_v27  ;;  %v856_v23 = vor.u32 %v1118_v18, %v853_v19 }
  0x1e   :  { %626 = vmatpush.bf16.msra.mxu0 %v1123_v28 }
  0x1f   :  { %640 = vmatpush.bf16.msra.mxu1 %v1131_v29 }
  0x20   :  { %654 = vmatpush.bf16.msra.mxu2 %v1139_v30 }
  0x21   :  { %668 = vmatpush.bf16.msra.mxu3 %v1147_v31  ;;  %627 = vmatmul.bf16.vlgmr.msra.gmra.mxu0 %v828_v46 }
  0x22   :  { %675 = vmatpush.bf16.msrb.mxu0 %v1162_v32  ;;  %641 = vmatmul.bf16.vlgmr.msra.gmra.mxu1 %v832_v47 }
  0x23   :  { %689 = vmatpush.bf16.msrb.mxu1 %v1170_v33  ;;  %655 = vmatmul.bf16.vlgmr.msra.gmra.mxu2 %v836_v44 }
  0x24   :  { %703 = vmatpush.bf16.msrb.mxu2 %v1178_v42  ;;  %669 = vmatmul.bf16.vlgmr.msra.gmra.mxu3 %v840_v45 }
  0x25   :  { %717 = vmatpush.bf16.msrb.mxu3 %v1186_v43 }
  0x26   :  { %676 = vmatpush.bf16.msrb.mxu0 %v1161_v48 }
  0x27   :  { %690 = vmatpush.bf16.msrb.mxu1 %v1169_v49 }
  0x28   :  { %704 = vmatpush.bf16.msrb.mxu2 %v1177_v50 }
  0x29   :  { %718 = vmatpush.bf16.msrb.mxu3 %v1185_v51 }
  0x2a   :  { %677 = vmatpush.bf16.msrb.mxu0 %v1160_v52 }
  0x2b   :  { %691 = vmatpush.bf16.msrb.mxu1 %v1168_v53 }
  0x2c   :  { %705 = vmatpush.bf16.msrb.mxu2 %v1176_v54 }
  0x2d   :  { %719 = vmatpush.bf16.msrb.mxu3 %v1184_v55 }
  0x2e   :  { %678 = vmatpush.bf16.msrb.mxu0 %v1159_v56  ;;  %v1189_v56 = vmov 1.0  }
  0x2f   :  { %692 = vmatpush.bf16.msrb.mxu1 %v1167_v57 }
  0x30   :  { %706 = vmatpush.bf16.msrb.mxu2 %v1175_v58 }
  0x31   :  { %720 = vmatpush.bf16.msrb.mxu3 %v1183_v59 }
  0x32   :  { %679 = vmatpush.bf16.msrb.mxu0 %v1158_v60 }
  0x33   :  { %693 = vmatpush.bf16.msrb.mxu1 %v1166_v61 }
  0x34   :  { %707 = vmatpush.bf16.msrb.mxu2 %v1174_v62 }
  0x35   :  { %721 = vmatpush.bf16.msrb.mxu3 %v1182_v63 }
  0x36   :  { %680 = vmatpush.bf16.msrb.mxu0 %v1157_v0 }
  0x37   :  { %694 = vmatpush.bf16.msrb.mxu1 %v1165_v1 }
  0x38   :  { %708 = vmatpush.bf16.msrb.mxu2 %v1173_v2 }
  0x39   :  { %722 = vmatpush.bf16.msrb.mxu3 %v1181_v3 }
  0x3a   :  { %681 = vmatpush.bf16.msrb.mxu0 %v1156_v4 }
  0x3b   :  { %695 = vmatpush.bf16.msrb.mxu1 %v1164_v5 }
  0x3c   :  { %709 = vmatpush.bf16.msrb.mxu2 %v1172_v6 }
  0x3d   :  { %723 = vmatpush.bf16.msrb.mxu3 %v1180_v7 }
  0x3e   :  { %682 = vmatpush.bf16.msrb.mxu0 %v1155_v8 }
  0x3f   :  { %696 = vmatpush.bf16.msrb.mxu1 %v1163_v9 }
  0x40   :  { %710 = vmatpush.bf16.msrb.mxu2 %v1171_v10 }
  0x41   :  { %724 = vmatpush.bf16.msrb.mxu3 %v1179_v11  ;;  %683 = vmatmul.bf16.vlgmr.msrb.gmra.mxu0 %v844_v20 }
  0x42   :  { %697 = vmatmul.bf16.vlgmr.msrb.gmra.mxu1 %v848_v21 }
  0x43   :  { %711 = vmatmul.bf16.vlgmr.msrb.gmra.mxu2 %v852_v22 }
  0x44   :  { %725 = vmatmul.bf16.vlgmr.msrb.gmra.mxu3 %v856_v23 }
  0x9e   :  { %v628_v24 = vpop.f32.mrf.mxu0 }
  0x9f   :  { %v642_v25 = vpop.f32.mrf.mxu1 }
  0xa0   :  { %v643_v28 = vadd.f32 %v642_v25, %v628_v24 }
  0xa6   :  { %v656_v26 = vpop.f32.mrf.mxu2  ;;  %v630_v29 = vpop.f32.mrf.mxu0 }
  0xa7   :  { %v670_v27 = vpop.f32.mrf.mxu3  ;;  %v644_v30 = vpop.f32.mrf.mxu1  ;;  %v657_v31 = vadd.f32 %v656_v26, %v643_v28 }
  0xa8   :  { %v645_v35 = vadd.f32 %v644_v30, %v630_v29 }
  0xa9   :  { %v671_v34 = vadd.f32 %v670_v27, %v657_v31 }
  0xae   :  { %v658_v32 = vpop.f32.mrf.mxu2 }
  0xaf   :  { %v672_v33 = vpop.f32.mrf.mxu3  ;;  %v659_v39 = vadd.f32 %v658_v32, %v645_v35 }
  0xb1   :  { %v673_v43 = vadd.f32 %v672_v33, %v659_v39 }
  0xbe   :  { %v684_v36 = vpop.f32.mrf.mxu0 }
  0xbf   :  { %v685_v37 = vadd.f32 %v684_v36, %v671_v34  ;;  %v698_v38 = vpop.f32.mrf.mxu1 }
  0xc1   :  { %v699_v40 = vadd.f32 %v698_v38, %v685_v37 }
  0xc6   :  { %v712_v41 = vpop.f32.mrf.mxu2  ;;  %v686_v45 = vpop.f32.mrf.mxu0 }
  0xc7   :  { %v726_v42 = vpop.f32.mrf.mxu3  ;;  %v713_v44 = vadd.f32 %v712_v41, %v699_v40  ;;  %v687_v47 = vadd.f32 %v686_v45, %v673_v43  ;;  %v700_v48 = vpop.f32.mrf.mxu1 }
  0xc9   :  { %v727_v46 = vadd.f32 %v726_v42, %v713_v44  ;;  %v701_v49 = vadd.f32 %v700_v48, %v687_v47 }
  0xcb   :  { %731 = vst [vmem:[%s1469_s2] sm:$0xff] %v727_v46  ;;  %v761_v55 = vmul.f32 %v727_v46, %v727_v46 }
  0xce   :  { %v714_v50 = vpop.f32.mrf.mxu2 }
  0xcf   :  { %v715_v51 = vadd.f32 %v714_v50, %v701_v49  ;;  %v728_v52 = vpop.f32.mrf.mxu3 }
  0xd1   :  { %v729_v53 = vadd.f32 %v728_v52, %v715_v51 }
  0xd3   :  { %732 = vst [vmem:[%s1469_s2 + $0x8] sm:$0xff] %v729_v53  ;;  %v762_v54 = vmul.f32 %v729_v53, %v729_v53  ;;  %752 = vmatpush.msra.mxu0 %v729_v53 }
  0xd5   :  { %753 = vmatpush.msra.mxu0 %v727_v46  ;;  %777 = vmatpush.msra.mxu1 %v762_v54 }
  0xd6   :  { %1113 = vmatmul.msk.f32.vlgmr.msra.gmra.mxu0 %vm734_vm0, %v1189_v56 }
  0xd7   :  { %778 = vmatpush.msra.mxu1 %v761_v55 }
  0xd8   :  { %1114 = vmatmul.msk.f32.vlgmr.msra.gmra.mxu1 %vm734_vm0, %v1189_v56 }
 0x153   :  { %v755_v57 = vpop.f32.mrf.mxu0 }
 0x154   :  { %759 = vst [vmem:[%s1470_s3] sm:$0xff] %v755_v57 }
 0x155   :  { %v780_v58 = vpop.f32.mrf.mxu1 }
 0x156   :  { %784 = vst [vmem:[%s1471_s4] sm:$0xff] %v780_v58 }

// kernel: encoder_block_forward.5
= control target key start
LH: loop header
LB: loop body
LE: loop exit
PB: predicated region body
PF: predicated region fallthrough
CT: control target
= control target key end

     0   :  { %s84_s0 = inlined_call_operand.vmem [shape: f32[16,128], index: 0, kind: input, shape index: {}]   ;;  %s85_s1 = inlined_call_operand.vmem [shape: f32[1,128], index: 1, kind: input, shape index: {}]   ;;  %s86_s2 = inlined_call_operand.vmem [shape: f32[1,128], index: 2, kind: input, shape index: {}]   ;;  %s87_s3 = inlined_call_operand.vmem [shape: bf16[16,128], index: 3, kind: output, shape index: {}]  }
   0x1   :  { %v14_v0 = vld [vmem:[%s84_s0] sm:$0xff]  ;;  %v15_v1 = vld [vmem:[%s84_s0 + $0x8] sm:$0xff] }
   0x2   :  { %v47_v2 = vld [vmem:[%s85_s1] ss:$0 sm:$0xff] }
   0x3   :  { %v48_v3 = vld [vmem:[%s86_s2] ss:$0 sm:$0xff]  ;;  %v20_v4 = vmul.f32 %v47_v2, %v14_v0  ;;  %v21_v5 = vmul.f32 %v47_v2, %v15_v1 }
   0x5   :  { %v26_v6 = vadd.f32 %v48_v3, %v20_v4  ;;  %v27_v7 = vadd.f32 %v48_v3, %v21_v5 }
   0x7   :  { %vm28_vm0 = vcmp.ge.f32.partialorder %v26_v6, 0.0  ;;  %vm29_vm1 = vcmp.ge.f32.partialorder %v27_v7, 0.0  ;;  %v30_v8 = vmul.f32 0.01, %v26_v6  ;;  %v31_v9 = vmul.f32 0.01, %v27_v7 }
   0x9   :  { %v32_v10 = vsel %vm28_vm0, %v26_v6, %v30_v8  ;;  %v33_v11 = vsel %vm29_vm1, %v27_v7, %v31_v9 }
   0xa   :  { %v45_v12 = vpack.c.bf16 %v33_v11, %v32_v10 }
   0xc   :  { %46 = vst [vmem:[%s87_s3] sm:$0xff] %v45_v12  }

// kernel: tile.33
= control target key start
LH: loop header
LB: loop body
LE: loop exit
PB: predicated region body
PF: predicated region fallthrough
CT: control target
= control target key end

     0   :  { %s22_s0 = inlined_call_operand.vmem [shape: f32[16], index: 0, kind: input, shape index: {}]   ;;  %s23_s1 = inlined_call_operand.vmem [shape: f32[8,16], index: 1, kind: output, shape index: {}]  }
   0x1   :  { %v4_v0 = vld [vmem:[%s22_s0] ss:$0 sm:$0xff] }
   0x2   :  { %5 = vst [vmem:[%s23_s1] sm:$0xff] %v4_v0 }

// kernel: tile.34
= control target key start
LH: loop header
LB: loop body
LE: loop exit
PB: predicated region body
PF: predicated region fallthrough
CT: control target
= control target key end

     0   :  { %s67_s10 = smov 112   ;;  %s68_s11 = smov 80   ;;  %vm3_vm0 = vcmask 130048   ;;  %vm9_vm1 = vcmask 1048448   ;;  %vm15_vm2 = vcmask 917248   ;;  %vm21_vm3 = vcmask 786048   ;;  %s111_s0 = inlined_call_operand.vmem [shape: f32[8,16], index: 0, kind: input, shape index: {}]   ;;  %s112_s1 = inlined_call_operand.vmem [shape: f32[1,128], index: 1, kind: output, shape index: {}]  }
   0x1   :  { %v53_v0 = vld [vmem:[%s111_s0 + $0x7] sm:$0x1]   ;;  %v55_v1 = vld [vmem:[%s111_s0 + $0x5] sm:$0x1]   ;;  %v57_v2 = vld [vmem:[%s111_s0 + $0x3] sm:$0x1]  }
   0x2   :  { %7 = vrot.lane.b32.xlu0 %v53_v0, %s67_s10  ;;  %19 = vrot.lane.b32.xlu1 %v55_v1, %s68_s11  ;;  %s69_s14 = smov 48   ;;  %v54_v3 = vld [vmem:[%s111_s0 + $0x6] sm:$0x1]   ;;  %v56_v4 = vld [vmem:[%s111_s0 + $0x4] sm:$0x1]   ;;  %s70_s21 = smov 96  }
   0x3   :  { %31 = vrot.lane.b32.xlu2 %v57_v2, %s69_s14  ;;  %v58_v5 = vld [vmem:[%s111_s0 + $0x2] sm:$0x1]   ;;  %s71_s22 = smov 64   ;;  %s72_s23 = smov 32   ;;  %v59_v6 = vld [vmem:[%s111_s0 + $0x1] sm:$0x1]  }
   0x4   :  { %s73_s26 = smov 16   ;;  %v2_v7 = vld [vmem:[%s111_s0] sm:$0x1]   ;;  %vm27_vm4 = vcmask 654848   ;;  %vm33_vm5 = vcmask 523648   ;;  %vm39_vm6 = vcmask 392448  }
   0x5   :  { %4 = vst.msk [vmem:[#allocation0] sm:$0x1] %vm3_vm0, %v2_v7   ;;  %vm45_vm7 = vcmask 261248  }
   0xa   :  { %13 = vrot.lane.b32.xlu0 %v54_v3, %s70_s21  ;;  %25 = vrot.lane.b32.xlu1 %v56_v4, %s71_s22 }
   0xb   :  { %37 = vrot.lane.b32.xlu2 %v58_v5, %s72_s23 }
  0x12   :  { %43 = vrot.lane.b32.xlu0 %v59_v6, %s73_s26 }
  0x5d   :  { %v32_v8 = vpop.permute.xlu2 %31  }
  0x65   :  { %v38_v9 = vpop.permute.xlu2 %37  }
  0x74   :  { %v8_v10 = vpop.permute.xlu0 %7   ;;  %v20_v11 = vpop.permute.xlu1 %19  }
  0x75   :  { %10 = vst.msk [vmem:[#allocation0] sm:$0x1] %vm9_vm1, %v8_v10  }
  0x7c   :  { %v14_v12 = vpop.permute.xlu0 %13   ;;  %v26_v13 = vpop.permute.xlu1 %25  }
  0x7d   :  { %16 = vst.msk [vmem:[#allocation0] sm:$0x1] %vm15_vm2, %v14_v12  }
  0x7e   :  { %22 = vst.msk [vmem:[#allocation0] sm:$0x1] %vm21_vm3, %v20_v11  }
  0x7f   :  { %28 = vst.msk [vmem:[#allocation0] sm:$0x1] %vm27_vm4, %v26_v13  }
  0x80   :  { %34 = vst.msk [vmem:[#allocation0] sm:$0x1] %vm33_vm5, %v32_v8  }
  0x81   :  { %40 = vst.msk [vmem:[#allocation0] sm:$0x1] %vm39_vm6, %v38_v9  }
  0x84   :  { %v44_v14 = vpop.permute.xlu0 %43  }
  0x85   :  { %46 = vst.msk [vmem:[#allocation0] sm:$0x1] %vm45_vm7, %v44_v14  }
  0x8c   :  { %v49_v15 = vld [vmem:[#allocation0] sm:$0x1] }
  0x8d   :  { %52 = vst [vmem:[%s112_s1] sm:$0x1] %v49_v15 }

// kernel: encoder_block_forward.7
= control target key start
LH: loop header
LB: loop body
LE: loop exit
PB: predicated region body
PF: predicated region fallthrough
CT: control target
= control target key end

     0   :  { %s80_s0 = inlined_call_operand.vmem [shape: f32[16,128], index: 0, kind: input, shape index: {}]   ;;  %s81_s1 = inlined_call_operand.vmem [shape: f32[1,128], index: 1, kind: input, shape index: {}]   ;;  %s82_s2 = inlined_call_operand.vmem [shape: f32[1,128], index: 2, kind: input, shape index: {}]   ;;  %s83_s3 = inlined_call_operand.vmem [shape: f32[16,128], index: 3, kind: output, shape index: {}]  }
   0x1   :  { %v14_v0 = vld [vmem:[%s80_s0] sm:$0xff]  ;;  %v15_v3 = vld [vmem:[%s80_s0 + $0x8] sm:$0xff] }
   0x2   :  { %v40_v1 = vld [vmem:[%s81_s1] ss:$0 sm:$0xff] }
   0x3   :  { %v41_v2 = vld [vmem:[%s82_s2] ss:$0 sm:$0xff]  ;;  %v20_v4 = vmul.f32 %v40_v1, %v14_v0  ;;  %v21_v5 = vmul.f32 %v40_v1, %v15_v3 }
   0x5   :  { %v26_v6 = vadd.f32 %v41_v2, %v20_v4  ;;  %v27_v7 = vadd.f32 %v41_v2, %v21_v5 }
   0x7   :  { %vm28_vm0 = vcmp.ge.f32.partialorder %v26_v6, 0.0  ;;  %v30_v8 = vmul.f32 0.01, %v26_v6  ;;  %vm29_vm1 = vcmp.ge.f32.partialorder %v27_v7, 0.0  ;;  %v31_v9 = vmul.f32 0.01, %v27_v7 }
   0x9   :  { %v32_v10 = vsel %vm28_vm0, %v26_v6, %v30_v8  ;;  %v33_v11 = vsel %vm29_vm1, %v27_v7, %v31_v9 }
   0xa   :  { %34 = vst [vmem:[%s83_s3] sm:$0xff] %v32_v10 }
   0xb   :  { %35 = vst [vmem:[%s83_s3 + $0x8] sm:$0xff] %v33_v11 }

</bundles_post_ra>
